<compile_context>
chip_gen: v7x
topology: tpu7x:2x2x1
jax: 0.10.0
libtpu: 0.0.40
codegen_flags: <defaults>
</compile_context>

<pallas_src>
import jax
import jax.numpy as jnp
from jax import lax
from jax.experimental import pallas as pl
from jax.experimental.pallas import tpu as pltpu

_LANE = 128


def _conv_block_kernel(w_ref, p_ref, o_ref):
    """One grid step == `bstep` samples.

    w_ref: (Cout, Kp)        bf16  packed conv weights (K zero-padded to 128)
    p_ref: (bstep, Kp, M)    bf16  K-major im2col patches for bstep samples
    o_ref: (bstep, Cout, M)  f32   channel-first output (native NCDHW layout)
    """
    bstep = p_ref.shape[0]
    m = p_ref.shape[-1]
    inv_m = 1.0 / m
    w = w_ref[...]                                   # (Cout, Kp) bf16

    for b in range(bstep):                           # static: 1 or 2 samples
        # --- 3x3x3 conv: one (Cout,Kp)x(Kp,M) MXU matmul, f32 accumulate ---
        acc = jnp.dot(w, p_ref[b], preferred_element_type=jnp.float32)

        # --- InstanceNorm3d (biased var, eps=1e-5), per-channel over M -----
        # Single-pass E[x^2]-E[x]^2 with a >=0 clamp; conv outputs here are
        # near zero-mean so cancellation is negligible at f32.
        s = jnp.sum(acc, axis=-1, keepdims=True)     # (Cout, 1)
        ss = jnp.sum(acc * acc, axis=-1, keepdims=True)
        mean = s * inv_m
        var = jnp.maximum(ss * inv_m - mean * mean, 0.0)
        scale = lax.rsqrt(var + 1e-5)                # EUP, on (Cout,1) only
        shift = -mean * scale
        y = acc * scale + shift                      # single VPU pass over acc

        # --- LeakyReLU(0.2) without cmp+select -----------------------------
        o_ref[b] = jnp.maximum(y, 0.2 * y).astype(o_ref.dtype)


def _tensorcores_per_chip():
    try:
        kind = jax.devices()[0].device_kind.lower()
    except Exception:
        return 1
    return 2 if ("v7" in kind or "7x" in kind) else 1


def conv_block(x_ncdhw, w_oidhw, *, batch_per_step=None):
    """ConvBlock forward.

    x_ncdhw: (N, Cin, D, H, W) f32 (PyTorch NCDHW layout)
    w_oidhw: (Cout, Cin, 3, 3, 3) f32 (PyTorch Conv3d weight layout)
    Returns  (N, Cout, D, H, W) f32.
    """
    N, Cin, D, H, W = x_ncdhw.shape
    Cout, _, kd_, kh_, kw_ = w_oidhw.shape
    M = D * H * W
    K = kd_ * kh_ * kw_ * Cin                    # 27 * Cin = 108
    Kp = pl.cdiv(K, _LANE) * _LANE               # 128

    # One grid step for the whole batch on single-TC chips (v5e/v6e);
    # one sample per step on v7x so the batch shards across its 2 TCs.
    if batch_per_step is None:
        batch_per_step = 1 if _tensorcores_per_chip() >= 2 else N
    if N % batch_per_step != 0:
        batch_per_step = 1

    # --- im2col in the wrapper (tiny; fuses in XLA), K-major, bf16 ----------
    # Feature order along K is (kd, kh, kw, cin), matching the weight repack.
    xp = jnp.pad(x_ncdhw, ((0, 0), (0, 0), (1, 1), (1, 1), (1, 1)))
    xp = xp.astype(jnp.bfloat16)
    taps = []
    for kd in range(kd_):
        for kh in range(kh_):
            for kw in range(kw_):
                taps.append(
                    xp[:, :, kd:kd + D, kh:kh + H, kw:kw + W].reshape(N, Cin, M))
    patches = jnp.concatenate(taps, axis=1)                    # (N, K, M)
    patches = jnp.pad(patches, ((0, 0), (0, Kp - K), (0, 0)))  # (N, Kp, M)

    # (Cout, Cin, kd, kh, kw) -> (Cout, kd, kh, kw, Cin) -> (Cout, K) -> pad K.
    w_flat = jnp.transpose(w_oidhw, (0, 2, 3, 4, 1)).reshape(Cout, K)
    w_packed = jnp.pad(w_flat, ((0, 0), (0, Kp - K))).astype(jnp.bfloat16)

    grid = (N // batch_per_step,)
    out = pl.pallas_call(
        _conv_block_kernel,
        out_shape=jax.ShapeDtypeStruct((N, Cout, M), jnp.float32),
        grid_spec=pltpu.PrefetchScalarGridSpec(
            num_scalar_prefetch=0,
            grid=grid,
            in_specs=[
                pl.BlockSpec((Cout, Kp), lambda g: (0, 0)),
                pl.BlockSpec((batch_per_step, Kp, M), lambda g: (g, 0, 0)),
            ],
            out_specs=pl.BlockSpec((batch_per_step, Cout, M),
                                   lambda g: (g, 0, 0)),
        ),
        compiler_params=pltpu.CompilerParams(
            dimension_semantics=("parallel",),
        ),
    )(w_packed, patches)

    # TODO(synk): add an M-tiled (grid=(N, M//TM), "arbitrary" M axis) variant
    # with accumulated norm stats before scaling spatial dims beyond ~16^3;
    # full-M blocks are ideal at M=512 on every generation.
    return out.reshape(N, Cout, D, H, W)


def conv_block_reference(x_ncdhw, w_oidhw):
    """Pure-JAX f32 reference matching PyTorch ConvBlock semantics."""
    out = lax.conv_general_dilated(
        x_ncdhw, w_oidhw,
        window_strides=(1, 1, 1),
        padding=((1, 1), (1, 1), (1, 1)),
        dimension_numbers=("NCDHW", "OIDHW", "NCDHW"),
    )
    mean = jnp.mean(out, axis=(2, 3, 4), keepdims=True)
    var = jnp.mean((out - mean) ** 2, axis=(2, 3, 4), keepdims=True)
    out = (out - mean) * lax.rsqrt(var + 1e-5)
    return jnp.where(out >= 0, out, 0.2 * out)


if __name__ == "__main__":
    # Small shapes implied by the module: batch=2, in_channels=4,
    # out_channels=8, spatial D=H=W=8.
    N, Cin, Cout, D, H, W = 2, 4, 8, 8, 8, 8

    key = jax.random.PRNGKey(0)
    kx, kw = jax.random.split(key)
    x = jax.random.normal(kx, (N, Cin, D, H, W), dtype=jnp.float32)
    w = 0.1 * jax.random.normal(kw, (Cout, Cin, 3, 3, 3), dtype=jnp.float32)

    out = jax.block_until_ready(conv_block(x, w))
    ref = conv_block_reference(x, w)

    assert out.shape == (N, Cout, D, H, W)
    # bf16 conv operands (f32 accumulate) vs. the pure-f32 reference:
    # normalized outputs are ~N(0,1), observed max error is ~2e-2.
    max_err = float(jnp.max(jnp.abs(out - ref)))
    assert jnp.allclose(out, ref, atol=5e-2, rtol=5e-2), max_err

    print("KERNEL_OK")
</pallas_src>

<mosaic_0001>
module attributes {stable_mosaic.version = 11 : i64} {
  func.func @_conv_block_kernel(%arg0: i32, %arg1: memref<8x128xbf16, #tpu.memory_space<vmem>>, %arg2: memref<2x128x512xbf16, #tpu.memory_space<vmem>>, %arg3: memref<2x8x512xf32, #tpu.memory_space<vmem>>) attributes {dimension_semantics = [#tpu.dimension_semantics<parallel>], iteration_bounds = array<i64: 1>, scalar_prefetch = 0 : i64, scratch_operands = 0 : i64, tpu.core_type = #tpu.core_type<tc>, window_params = [{pipeline_mode = #tpu.pipeline_mode<synchronous>, transform_indices = @transform_0, window_bounds = array<i64: 8, 128>}, {transform_indices = @transform_1, window_bounds = array<i64: 2, 128, 512>}, {transform_indices = @transform_2, window_bounds = array<i64: 2, 8, 512>}]} {
    %c0 = arith.constant 0 : index
    %c0_0 = arith.constant 0 : index
    %0 = vector.load %arg1[%c0, %c0_0] : memref<8x128xbf16, #tpu.memory_space<vmem>>, vector<8x128xbf16>
    %c0_1 = arith.constant 0 : index
    %c0_2 = arith.constant 0 : index
    %c0_3 = arith.constant 0 : index
    %1 = vector.load %arg2[%c0_1, %c0_2, %c0_3] : memref<2x128x512xbf16, #tpu.memory_space<vmem>>, vector<1x128x512xbf16>
    %2 = vector.shape_cast %1 : vector<1x128x512xbf16> to vector<128x512xbf16>
    %cst = arith.constant dense<0.000000e+00> : vector<8x512xf32>
    %3 = tpu.matmul %0, %2, %cst {dimension_numbers = #tpu.dot_dimension_numbers<[1], [0], [0], [1], [0, 0, 1, 1], [], []>} : vector<8x128xbf16>, vector<128x512xbf16>, vector<8x512xf32> -> vector<8x512xf32>
    %cst_4 = arith.constant dense<0.000000e+00> : vector<8xf32>
    %4 = vector.multi_reduction <add>, %3, %cst_4 [1] : vector<8x512xf32> to vector<8xf32>
    %5 = vector.shape_cast %4 : vector<8xf32> to vector<8x1xf32>
    %6 = arith.mulf %3, %3 : vector<8x512xf32>
    %cst_5 = arith.constant dense<0.000000e+00> : vector<8xf32>
    %7 = vector.multi_reduction <add>, %6, %cst_5 [1] : vector<8x512xf32> to vector<8xf32>
    %8 = vector.shape_cast %7 : vector<8xf32> to vector<8x1xf32>
    %cst_6 = arith.constant 0.001953125 : f32
    %9 = vector.broadcast %cst_6 : f32 to vector<8x1xf32>
    %10 = arith.mulf %5, %9 : vector<8x1xf32>
    %cst_7 = arith.constant 0.001953125 : f32
    %11 = vector.broadcast %cst_7 : f32 to vector<8x1xf32>
    %12 = arith.mulf %8, %11 : vector<8x1xf32>
    %13 = arith.mulf %10, %10 : vector<8x1xf32>
    %14 = arith.subf %12, %13 : vector<8x1xf32>
    %cst_8 = arith.constant 0.000000e+00 : f32
    %15 = vector.broadcast %cst_8 : f32 to vector<8x1xf32>
    %16 = arith.maximumf %14, %15 : vector<8x1xf32>
    %cst_9 = arith.constant 9.99999974E-6 : f32
    %17 = vector.broadcast %cst_9 : f32 to vector<8x1xf32>
    %18 = arith.addf %16, %17 : vector<8x1xf32>
    %19 = math.rsqrt %18 : vector<8x1xf32>
    %cst_10 = arith.constant 0.000000e+00 : f32
    %20 = vector.broadcast %cst_10 : f32 to vector<8x1xf32>
    %21 = arith.subf %20, %10 : vector<8x1xf32>
    %22 = arith.mulf %21, %19 : vector<8x1xf32>
    %23 = vector.broadcast %19 : vector<8x1xf32> to vector<8x512xf32>
    %24 = arith.mulf %3, %23 : vector<8x512xf32>
    %25 = vector.broadcast %22 : vector<8x1xf32> to vector<8x512xf32>
    %26 = arith.addf %24, %25 : vector<8x512xf32>
    %cst_11 = arith.constant 2.000000e-01 : f32
    %27 = vector.broadcast %cst_11 : f32 to vector<8x512xf32>
    %28 = arith.mulf %27, %26 : vector<8x512xf32>
    %29 = arith.maximumf %26, %28 : vector<8x512xf32>
    %c0_12 = arith.constant 0 : index
    %c0_13 = arith.constant 0 : index
    %c0_14 = arith.constant 0 : index
    %30 = vector.load %arg3[%c0_12, %c0_13, %c0_14] : memref<2x8x512xf32, #tpu.memory_space<vmem>>, vector<1x8x512xf32>
    %31 = vector.shape_cast %30 : vector<1x8x512xf32> to vector<8x512xf32>
    %32 = vector.shape_cast %29 : vector<8x512xf32> to vector<1x8x512xf32>
    tpu.vector_store %arg3[%c0_12, %c0_13, %c0_14], %32 {strides = array<i32>} : memref<2x8x512xf32, #tpu.memory_space<vmem>>, vector<1x8x512xf32>,
    %c1 = arith.constant 1 : index
    %c0_15 = arith.constant 0 : index
    %c0_16 = arith.constant 0 : index
    %33 = vector.load %arg2[%c1, %c0_15, %c0_16] : memref<2x128x512xbf16, #tpu.memory_space<vmem>>, vector<1x128x512xbf16>
    %34 = vector.shape_cast %33 : vector<1x128x512xbf16> to vector<128x512xbf16>
    %cst_17 = arith.constant dense<0.000000e+00> : vector<8x512xf32>
    %35 = tpu.matmul %0, %34, %cst_17 {dimension_numbers = #tpu.dot_dimension_numbers<[1], [0], [0], [1], [0, 0, 1, 1], [], []>} : vector<8x128xbf16>, vector<128x512xbf16>, vector<8x512xf32> -> vector<8x512xf32>
    %cst_18 = arith.constant dense<0.000000e+00> : vector<8xf32>
    %36 = vector.multi_reduction <add>, %35, %cst_18 [1] : vector<8x512xf32> to vector<8xf32>
    %37 = vector.shape_cast %36 : vector<8xf32> to vector<8x1xf32>
    %38 = arith.mulf %35, %35 : vector<8x512xf32>
    %cst_19 = arith.constant dense<0.000000e+00> : vector<8xf32>
    %39 = vector.multi_reduction <add>, %38, %cst_19 [1] : vector<8x512xf32> to vector<8xf32>
    %40 = vector.shape_cast %39 : vector<8xf32> to vector<8x1xf32>
    %cst_20 = arith.constant 0.001953125 : f32
    %41 = vector.broadcast %cst_20 : f32 to vector<8x1xf32>
    %42 = arith.mulf %37, %41 : vector<8x1xf32>
    %cst_21 = arith.constant 0.001953125 : f32
    %43 = vector.broadcast %cst_21 : f32 to vector<8x1xf32>
    %44 = arith.mulf %40, %43 : vector<8x1xf32>
    %45 = arith.mulf %42, %42 : vector<8x1xf32>
    %46 = arith.subf %44, %45 : vector<8x1xf32>
    %cst_22 = arith.constant 0.000000e+00 : f32
    %47 = vector.broadcast %cst_22 : f32 to vector<8x1xf32>
    %48 = arith.maximumf %46, %47 : vector<8x1xf32>
    %cst_23 = arith.constant 9.99999974E-6 : f32
    %49 = vector.broadcast %cst_23 : f32 to vector<8x1xf32>
    %50 = arith.addf %48, %49 : vector<8x1xf32>
    %51 = math.rsqrt %50 : vector<8x1xf32>
    %cst_24 = arith.constant 0.000000e+00 : f32
    %52 = vector.broadcast %cst_24 : f32 to vector<8x1xf32>
    %53 = arith.subf %52, %42 : vector<8x1xf32>
    %54 = arith.mulf %53, %51 : vector<8x1xf32>
    %55 = vector.broadcast %51 : vector<8x1xf32> to vector<8x512xf32>
    %56 = arith.mulf %35, %55 : vector<8x512xf32>
    %57 = vector.broadcast %54 : vector<8x1xf32> to vector<8x512xf32>
    %58 = arith.addf %56, %57 : vector<8x512xf32>
    %cst_25 = arith.constant 2.000000e-01 : f32
    %59 = vector.broadcast %cst_25 : f32 to vector<8x512xf32>
    %60 = arith.mulf %59, %58 : vector<8x512xf32>
    %61 = arith.maximumf %58, %60 : vector<8x512xf32>
    %c1_26 = arith.constant 1 : index
    %c0_27 = arith.constant 0 : index
    %c0_28 = arith.constant 0 : index
    %62 = vector.load %arg3[%c1_26, %c0_27, %c0_28] : memref<2x8x512xf32, #tpu.memory_space<vmem>>, vector<1x8x512xf32>
    %63 = vector.shape_cast %62 : vector<1x8x512xf32> to vector<8x512xf32>
    %64 = vector.shape_cast %61 : vector<8x512xf32> to vector<1x8x512xf32>
    tpu.vector_store %arg3[%c1_26, %c0_27, %c0_28], %64 {strides = array<i32>} : memref<2x8x512xf32, #tpu.memory_space<vmem>>, vector<1x8x512xf32>,
    return
  }
  func.func @transform_0(%arg0: i32) -> (i32, i32) {
    %c0_i32 = arith.constant 0 : i32
    %c0_i32_0 = arith.constant 0 : i32
    %c0_i32_1 = arith.constant 0 : i32
    return %c0_i32, %c0_i32_0 : i32, i32
  }
  func.func @transform_1(%arg0: i32) -> (i32, i32, i32) {
    %c0_i32 = arith.constant 0 : i32
    %c0_i32_0 = arith.constant 0 : i32
    %c0_i32_1 = arith.constant 0 : i32
    return %arg0, %c0_i32, %c0_i32_0 : i32, i32, i32
  }
  func.func @transform_2(%arg0: i32) -> (i32, i32, i32) {
    %c0_i32 = arith.constant 0 : i32
    %c0_i32_0 = arith.constant 0 : i32
    %c0_i32_1 = arith.constant 0 : i32
    return %arg0, %c0_i32, %c0_i32_0 : i32, i32, i32
  }
}

</mosaic_0001>

<bundles_post_ra>
// kernel: tpu_custom_call.1
= control target key start
LH: loop header
LB: loop body
LE: loop exit
PB: predicated region body
PF: predicated region fallthrough
CT: control target
= control target key end

     0   :  { %7 = vsyncpa [#allocation3], 0  ;;  %s1032_s0 = inlined_call_operand.hbm [shape: bf16[8,128], index: 0, kind: input, shape index: {}]   ;;  %s1033_s1 = inlined_call_operand.hbm [shape: bf16[2,128,512], index: 1, kind: input, shape index: {}]   ;;  %s1034_s2 = inlined_call_operand.hbm [shape: f32[2,8,512], index: 2, kind: output, shape index: {}]  }
   0x1   :  { %8 = vsyncpa [#allocation6], 0 }
   0x2   :  { %9 = vsyncpa [#allocation4], 0  ;;  %s938_s9 = smov [#allocation2]   ;;  %s939_s11 = smov [#allocation5]  }
   0x3   :  { %s16_s10 = sshll.u32 %s938_s9, 4  ;;  %s25_s12 = sshll.u32 %s939_s11, 4  ;;  %s17_s10 = int_to_ptr.vmem [resolvable:$true] %s16_s10  ;;  %s961_s12 = int_to_ptr.vmem [resolvable:$true] %s25_s12 }
   0x4   :  { %s866_s15 = scalar_lea.hbm %s1032_s0, 64 }
   0x5   :  { %p867_p0 = scmp.ne.s32.totalorder %s1032_s0, %s866_s15  ;;  %p870_p1 = scmp.lt.u32.totalorder %s866_s15, %s1032_s0 }
   0x7   :  { %p872_p2 = pnand %p870_p1, %p867_p0 }
   0x9   :  { %875 = shalt.err (!%p872_p2)
}
   0xa   :  { %s876_s20 = scalar_lea.vmem %s17_s10, 64  ;;  %p881_p4 = scmp.lt.s32.totalorder %s17_s10, %s17_s10 }
   0xb   :  { %p877_p3 = scmp.ne.s32.totalorder %s17_s10, %s876_s20  ;;  %p882_p5 = scmp.lt.s32.totalorder %s876_s20, %s876_s20 }
   0xd   :  { %p883_p6 = por %p882_p5, %p881_p4 }
   0xf   :  { %p884_p7 = pnand %p883_p6, %p877_p3 }
  0x11   :  { %887 = shalt.err (!%p884_p7)
}
  0x12   :  { %19 = dma.hbm_to_vmem [thread:$0]  %s1032_s0, 64, %s17_s10, [#allocation3]  }
  0x13   :  { %s888_s25 = scalar_lea.hbm %s1033_s1, 8192 }
  0x14   :  { %p889_p8 = scmp.ne.s32.totalorder %s1033_s1, %s888_s25  ;;  %p892_p9 = scmp.lt.u32.totalorder %s888_s25, %s1033_s1 }
  0x16   :  { %p894_p10 = pnand %p892_p9, %p889_p8 }
  0x18   :  { %897 = shalt.err (!%p894_p10)
}
  0x19   :  { %s898_s30 = scalar_lea.vmem %s961_s12, 8192  ;;  %p903_p12 = scmp.lt.s32.totalorder %s961_s12, %s961_s12 }
  0x1a   :  { %p899_p11 = scmp.ne.s32.totalorder %s961_s12, %s898_s30  ;;  %p904_p13 = scmp.lt.s32.totalorder %s898_s30, %s898_s30 }
  0x1c   :  { %p905_p0 = por %p904_p13, %p903_p12 }
  0x1e   :  { %p906_p1 = pnand %p905_p0, %p899_p11 }
  0x20   :  { %909 = shalt.err (!%p906_p1)
}
  0x21   :  { %s940_s0 = smov 256   ;;  %s941_s3 = smov 16  }
  0x22   :  { %31 = dma.hbm_to_vmem [thread:$0]  %s1033_s1, 8192, %s961_s12, [#allocation6], %s940_s0, %s940_s0, %s941_s3  }
  0x23   :  { %932 = dma.done.wait [#allocation3], 64  }
  0x24   :  { %933 = vsyncadd [#allocation3], 4294967232 }
  0x25   :  { %934 = dma.done.wait [#allocation6], 8192  }
  0x26   :  { %935 = vsyncadd [#allocation6], 4294959104  ;;  %v942_v0 = vmov 0   ;;  %v766_v1 = vld [vmem:[#allocation5 + $0x4] ss:$16 sps:$4 sm:$0xff]   ;;  %s943_s1 = smov [#allocation7]  }
  0x27   :  { %264 = vmatprep.mubr.bf16.mxu0 %v942_v0  ;;  %305 = vmatprep.mubr.bf16.mxu1 %v942_v0  ;;  %v768_v2 = vld [vmem:[#allocation5 + $0xc] ss:$16 sps:$4 sm:$0xff]   ;;  %v770_v3 = vld [vmem:[#allocation5] ss:$16 sps:$4 sm:$0xff]   ;;  %v771_v4 = vld [vmem:[#allocation5 + $0x8] ss:$16 sps:$4 sm:$0xff]  }
  0x28   :  { %232 = vmatprep.subr.bf16.mxu0 %v766_v1  ;;  %273 = vmatprep.subr.bf16.mxu1 %v768_v2  ;;  %v772_v5 = vld [vmem:[#allocation5 + $0x24] ss:$16 sps:$4 sm:$0xff]   ;;  %v774_v6 = vld [vmem:[#allocation5 + $0x2c] ss:$16 sps:$4 sm:$0xff]   ;;  %v776_v7 = vld [vmem:[#allocation5 + $0x20] ss:$16 sps:$4 sm:$0xff]  }
  0x29   :  { %233 = vmatpush1.bf16.msra.mxu0 %v770_v3  ;;  %274 = vmatpush1.bf16.msra.mxu1 %v771_v4  ;;  %v777_v8 = vld [vmem:[#allocation5 + $0x28] ss:$16 sps:$4 sm:$0xff]   ;;  %v778_v9 = vld [vmem:[#allocation5 + $0x44] ss:$16 sps:$4 sm:$0xff]   ;;  %v780_v10 = vld [vmem:[#allocation5 + $0x4c] ss:$16 sps:$4 sm:$0xff]  }
  0x2a   :  { %234 = vmatprep.subr.bf16.mxu0 %v772_v5  ;;  %275 = vmatprep.subr.bf16.mxu1 %v774_v6  ;;  %v782_v11 = vld [vmem:[#allocation5 + $0x40] ss:$16 sps:$4 sm:$0xff]   ;;  %v783_v12 = vld [vmem:[#allocation5 + $0x48] ss:$16 sps:$4 sm:$0xff]   ;;  %v784_v13 = vld [vmem:[#allocation5 + $0x64] ss:$16 sps:$4 sm:$0xff]  }
  0x2b   :  { %v786_v14 = vld [vmem:[#allocation5 + $0x6c] ss:$16 sps:$4 sm:$0xff]   ;;  %v788_v15 = vld [vmem:[#allocation5 + $0x60] ss:$16 sps:$4 sm:$0xff]   ;;  %v789_v16 = vld [vmem:[#allocation5 + $0x68] ss:$16 sps:$4 sm:$0xff]  }
  0x2c   :  { %v790_v17 = vld [vmem:[#allocation5 + $0x84] ss:$16 sps:$4 sm:$0xff]   ;;  %v792_v18 = vld [vmem:[#allocation5 + $0x8c] ss:$16 sps:$4 sm:$0xff]   ;;  %v794_v19 = vld [vmem:[#allocation5 + $0x80] ss:$16 sps:$4 sm:$0xff]  }
  0x2d   :  { %235 = vmatpush1.bf16.msra.mxu0 %v776_v7  ;;  %276 = vmatpush1.bf16.msra.mxu1 %v777_v8  ;;  %v795_v20 = vld [vmem:[#allocation5 + $0x88] ss:$16 sps:$4 sm:$0xff]   ;;  %v796_v21 = vld [vmem:[#allocation5 + $0xa4] ss:$16 sps:$4 sm:$0xff]   ;;  %v798_v22 = vld [vmem:[#allocation5 + $0xac] ss:$16 sps:$4 sm:$0xff]  }
  0x2e   :  { %236 = vmatprep.subr.bf16.mxu0 %v778_v9  ;;  %277 = vmatprep.subr.bf16.mxu1 %v780_v10  ;;  %v800_v23 = vld [vmem:[#allocation5 + $0xa0] ss:$16 sps:$4 sm:$0xff]   ;;  %v801_v24 = vld [vmem:[#allocation5 + $0xa8] ss:$16 sps:$4 sm:$0xff]   ;;  %v802_v25 = vld [vmem:[#allocation5 + $0xc4] ss:$16 sps:$4 sm:$0xff]  }
  0x2f   :  { %v804_v26 = vld [vmem:[#allocation5 + $0xcc] ss:$16 sps:$4 sm:$0xff]   ;;  %v806_v27 = vld [vmem:[#allocation5 + $0xc0] ss:$16 sps:$4 sm:$0xff]   ;;  %v807_v28 = vld [vmem:[#allocation5 + $0xc8] ss:$16 sps:$4 sm:$0xff]  }
  0x30   :  { %v808_v29 = vld [vmem:[#allocation5 + $0xe4] ss:$16 sps:$4 sm:$0xff]   ;;  %v810_v30 = vld [vmem:[#allocation5 + $0xec] ss:$16 sps:$4 sm:$0xff]   ;;  %v812_v31 = vld [vmem:[#allocation5 + $0xe0] ss:$16 sps:$4 sm:$0xff]  }
  0x31   :  { %237 = vmatpush1.bf16.msra.mxu0 %v782_v11  ;;  %278 = vmatpush1.bf16.msra.mxu1 %v783_v12  ;;  %v813_v32 = vld [vmem:[#allocation5 + $0xe8] ss:$16 sps:$4 sm:$0xff]   ;;  %v816_v33 = vld [vmem:[#allocation5 + $0x104] ss:$16 sps:$4 sm:$0xff]   ;;  %v819_v34 = vld [vmem:[#allocation5 + $0x10c] ss:$16 sps:$4 sm:$0xff]  }
  0x32   :  { %238 = vmatprep.subr.bf16.mxu0 %v784_v13  ;;  %279 = vmatprep.subr.bf16.mxu1 %v786_v14  ;;  %v994_v35 = vld [vmem:[#allocation2] sm:$0xf]  ;;  %v814_v36 = vld [vmem:[#allocation5 + $0x100] ss:$16 sps:$4 sm:$0xff]   ;;  %v817_v37 = vld [vmem:[#allocation5 + $0x108] ss:$16 sps:$4 sm:$0xff]  }
  0x33   :  { %v822_v38 = vld [vmem:[#allocation5 + $0x124] ss:$16 sps:$4 sm:$0xff]   ;;  %v825_v39 = vld [vmem:[#allocation5 + $0x12c] ss:$16 sps:$4 sm:$0xff]   ;;  %v820_v40 = vld [vmem:[#allocation5 + $0x120] ss:$16 sps:$4 sm:$0xff]  }
  0x34   :  { %v823_v41 = vld [vmem:[#allocation5 + $0x128] ss:$16 sps:$4 sm:$0xff]   ;;  %v828_v42 = vld [vmem:[#allocation5 + $0x144] ss:$16 sps:$4 sm:$0xff]   ;;  %v831_v43 = vld [vmem:[#allocation5 + $0x14c] ss:$16 sps:$4 sm:$0xff]  }
  0x35   :  { %239 = vmatpush1.bf16.msra.mxu0 %v788_v15  ;;  %280 = vmatpush1.bf16.msra.mxu1 %v789_v16  ;;  %v826_v44 = vld [vmem:[#allocation5 + $0x140] ss:$16 sps:$4 sm:$0xff]   ;;  %v829_v45 = vld [vmem:[#allocation5 + $0x148] ss:$16 sps:$4 sm:$0xff]   ;;  %v834_v46 = vld [vmem:[#allocation5 + $0x164] ss:$16 sps:$4 sm:$0xff]  }
  0x36   :  { %240 = vmatprep.subr.bf16.mxu0 %v790_v17  ;;  %281 = vmatprep.subr.bf16.mxu1 %v792_v18  ;;  %v837_v47 = vld [vmem:[#allocation5 + $0x16c] ss:$16 sps:$4 sm:$0xff]   ;;  %v832_v48 = vld [vmem:[#allocation5 + $0x160] ss:$16 sps:$4 sm:$0xff]   ;;  %v835_v49 = vld [vmem:[#allocation5 + $0x168] ss:$16 sps:$4 sm:$0xff]  }
  0x37   :  { %v840_v50 = vld [vmem:[#allocation5 + $0x184] ss:$16 sps:$4 sm:$0xff]   ;;  %v843_v51 = vld [vmem:[#allocation5 + $0x18c] ss:$16 sps:$4 sm:$0xff]   ;;  %v838_v52 = vld [vmem:[#allocation5 + $0x180] ss:$16 sps:$4 sm:$0xff]  }
  0x38   :  { %v841_v53 = vld [vmem:[#allocation5 + $0x188] ss:$16 sps:$4 sm:$0xff]   ;;  %v846_v54 = vld [vmem:[#allocation5 + $0x1a4] ss:$16 sps:$4 sm:$0xff]   ;;  %v849_v55 = vld [vmem:[#allocation5 + $0x1ac] ss:$16 sps:$4 sm:$0xff]  }
  0x39   :  { %241 = vmatpush1.bf16.msra.mxu0 %v794_v19  ;;  %282 = vmatpush1.bf16.msra.mxu1 %v795_v20  ;;  %v844_v56 = vld [vmem:[#allocation5 + $0x1a0] ss:$16 sps:$4 sm:$0xff]   ;;  %v847_v57 = vld [vmem:[#allocation5 + $0x1a8] ss:$16 sps:$4 sm:$0xff]   ;;  %v852_v58 = vld [vmem:[#allocation5 + $0x1c4] ss:$16 sps:$4 sm:$0xff]  }
  0x3a   :  { %242 = vmatprep.subr.bf16.mxu0 %v796_v21  ;;  %283 = vmatprep.subr.bf16.mxu1 %v798_v22  ;;  %v855_v59 = vld [vmem:[#allocation5 + $0x1cc] ss:$16 sps:$4 sm:$0xff]   ;;  %v850_v60 = vld [vmem:[#allocation5 + $0x1c0] ss:$16 sps:$4 sm:$0xff]   ;;  %v853_v61 = vld [vmem:[#allocation5 + $0x1c8] ss:$16 sps:$4 sm:$0xff]  }
  0x3b   :  { %v858_v62 = vld [vmem:[#allocation5 + $0x1e4] ss:$16 sps:$4 sm:$0xff]   ;;  %v861_v63 = vld [vmem:[#allocation5 + $0x1ec] ss:$16 sps:$4 sm:$0xff]   ;;  %v859_v1 = vld [vmem:[#allocation5 + $0x1e8] ss:$16 sps:$4 sm:$0xff]  }
  0x3c   :  { %s681_s6 = sshll.u32 %s943_s1, 4  ;;  %s682_s6 = int_to_ptr.vmem [resolvable:$true] %s681_s6 }
  0x3d   :  { %243 = vmatpush1.bf16.msra.mxu0 %v800_v23  ;;  %284 = vmatpush1.bf16.msra.mxu1 %v801_v24  ;;  %s910_s7 = scalar_lea.vmem %s682_s6, 1024  ;;  %p915_p3 = scmp.lt.s32.totalorder %s682_s6, %s682_s6 }
  0x3e   :  { %244 = vmatprep.subr.bf16.mxu0 %v802_v25  ;;  %285 = vmatprep.subr.bf16.mxu1 %v804_v26  ;;  %p911_p2 = scmp.ne.s32.totalorder %s682_s6, %s910_s7  ;;  %p916_p4 = scmp.lt.s32.totalorder %s910_s7, %s910_s7 }
  0x40   :  { %p917_p5 = por %p916_p4, %p915_p3 }
  0x41   :  { %245 = vmatpush1.bf16.msra.mxu0 %v806_v27  ;;  %286 = vmatpush1.bf16.msra.mxu1 %v807_v28 }
  0x42   :  { %246 = vmatprep.subr.bf16.mxu0 %v808_v29  ;;  %287 = vmatprep.subr.bf16.mxu1 %v810_v30  ;;  %p918_p6 = pnand %p917_p5, %p911_p2 }
  0x45   :  { %247 = vmatpush1.bf16.msra.mxu0 %v812_v31  ;;  %288 = vmatpush1.bf16.msra.mxu1 %v813_v32 }
  0x46   :  { %550 = vmatprep.subr.bf16.mxu0 %v816_v33  ;;  %591 = vmatprep.subr.bf16.mxu1 %v819_v34 }
  0x48   :  { %265 = vmatmul.mubr.bf16.vlgmr.msra.gmra.mrb[0].mxu0 %v994_v35  ;;  %306 = vmatmul.mubr.bf16.vlgmr.msra.gmra.mrb[0].mxu1 %v994_v35 }
  0x49   :  { %551 = vmatpush1.bf16.msra.mxu0 %v814_v36  ;;  %592 = vmatpush1.bf16.msra.mxu1 %v817_v37 }
  0x4a   :  { %552 = vmatprep.subr.bf16.mxu0 %v822_v38  ;;  %593 = vmatprep.subr.bf16.mxu1 %v825_v39 }
  0x4b   :  { %582 = vmatprep.mubr.bf16.mxu0 %v942_v0  ;;  %623 = vmatprep.mubr.bf16.mxu1 %v942_v0  ;;  %v856_v0 = vld [vmem:[#allocation5 + $0x1e0] ss:$16 sps:$4 sm:$0xff]  }
  0x4d   :  { %553 = vmatpush1.bf16.msra.mxu0 %v820_v40  ;;  %594 = vmatpush1.bf16.msra.mxu1 %v823_v41 }
  0x4e   :  { %554 = vmatprep.subr.bf16.mxu0 %v828_v42  ;;  %595 = vmatprep.subr.bf16.mxu1 %v831_v43 }
  0x51   :  { %555 = vmatpush1.bf16.msra.mxu0 %v826_v44  ;;  %596 = vmatpush1.bf16.msra.mxu1 %v829_v45 }
  0x52   :  { %556 = vmatprep.subr.bf16.mxu0 %v834_v46  ;;  %597 = vmatprep.subr.bf16.mxu1 %v837_v47 }
  0x55   :  { %557 = vmatpush1.bf16.msra.mxu0 %v832_v48  ;;  %598 = vmatpush1.bf16.msra.mxu1 %v835_v49 }
  0x56   :  { %558 = vmatprep.subr.bf16.mxu0 %v840_v50  ;;  %599 = vmatprep.subr.bf16.mxu1 %v843_v51 }
  0x59   :  { %559 = vmatpush1.bf16.msra.mxu0 %v838_v52  ;;  %600 = vmatpush1.bf16.msra.mxu1 %v841_v53 }
  0x5a   :  { %560 = vmatprep.subr.bf16.mxu0 %v846_v54  ;;  %601 = vmatprep.subr.bf16.mxu1 %v849_v55 }
  0x5d   :  { %561 = vmatpush1.bf16.msra.mxu0 %v844_v56  ;;  %602 = vmatpush1.bf16.msra.mxu1 %v847_v57 }
  0x5e   :  { %562 = vmatprep.subr.bf16.mxu0 %v852_v58  ;;  %603 = vmatprep.subr.bf16.mxu1 %v855_v59 }
  0x61   :  { %563 = vmatpush1.bf16.msra.mxu0 %v850_v60  ;;  %604 = vmatpush1.bf16.msra.mxu1 %v853_v61 }
  0x62   :  { %564 = vmatprep.subr.bf16.mxu0 %v858_v62  ;;  %605 = vmatprep.subr.bf16.mxu1 %v861_v63 }
  0x65   :  { %565 = vmatpush1.bf16.msra.mxu0 %v856_v0  ;;  %606 = vmatpush1.bf16.msra.mxu1 %v859_v1 }
  0x68   :  { %583 = vmatmul.mubr.bf16.vlgmr.msra.gmra.mrb[4].mxu0 %v994_v35  ;;  %624 = vmatmul.mubr.bf16.vlgmr.msra.gmra.mrb[4].mxu1 %v994_v35 }
 0x11b   :  { %v266_v2 = vpop.f32.mrb[0].mxu0  ;;  %v307_v3 = vpop.f32.mrb[0].mxu1 }
 0x11c   :  { %v319_v4 = vmul.f32 %v266_v2, %v266_v2  ;;  %v268_v5 = vpop.f32.mrb[1].mxu0  ;;  %v309_v6 = vpop.f32.mrb[1].mxu1  ;;  %v321_v9 = vmul.f32 %v307_v3, %v307_v3 }
 0x11d   :  { %v314_v7 = vadd.f32 %v268_v5, %v266_v2  ;;  %v320_v8 = vmul.f32 %v268_v5, %v268_v5  ;;  %v270_v10 = vpop.f32.mrb[2].mxu0  ;;  %v311_v11 = vpop.f32.mrb[2].mxu1  ;;  %v322_v15 = vmul.f32 %v309_v6, %v309_v6 }
 0x11e   :  { %v271_v12 = vpop.f32.mrb[3].mxu0  ;;  %v312_v13 = vpop.f32.mrb[3].mxu1 }
 0x11f   :  { %v315_v14 = vadd.f32 %v314_v7, %v307_v3  ;;  %v323_v16 = vadd.f32 %v320_v8, %v319_v4 }
 0x121   :  { %v316_v17 = vadd.f32 %v315_v14, %v309_v6  ;;  %v324_v18 = vadd.f32 %v323_v16, %v321_v9 }
 0x123   :  { %317 = vadd.xlane.f32.xlu0 %v316_v17  ;;  %v325_v19 = vadd.f32 %v324_v18, %v322_v15 }
 0x125   :  { %326 = vadd.xlane.f32.xlu1 %v325_v19 }
 0x13b   :  { %v1002_v20 = vpop.f32.mrb[4].mxu0  ;;  %v1004_v21 = vpop.f32.mrb[4].mxu1 }
 0x13c   :  { %v637_v22 = vmul.f32 %v1002_v20, %v1002_v20  ;;  %v586_v23 = vpop.f32.mrb[5].mxu0  ;;  %v1008_v24 = vpop.f32.mrb[5].mxu1  ;;  %v639_v25 = vmul.f32 %v1004_v21, %v1004_v21 }
 0x13d   :  { %v632_v26 = vadd.f32 %v586_v23, %v1002_v20  ;;  %v638_v27 = vmul.f32 %v586_v23, %v586_v23  ;;  %v588_v28 = vpop.f32.mrb[6].mxu0  ;;  %v629_v29 = vpop.f32.mrb[6].mxu1  ;;  %v640_v35 = vmul.f32 %v1008_v24, %v1008_v24 }
 0x13e   :  { %v589_v30 = vpop.f32.mrb[7].mxu0  ;;  %v630_v31 = vpop.f32.mrb[7].mxu1 }
 0x13f   :  { %v633_v32 = vadd.f32 %v632_v26, %v1004_v21  ;;  %v641_v33 = vadd.f32 %v638_v27, %v637_v22 }
 0x141   :  { %v634_v34 = vadd.f32 %v633_v32, %v1008_v24  ;;  %v642_v36 = vadd.f32 %v641_v33, %v639_v25 }
 0x143   :  { %635 = vadd.xlane.f32.xlu0 %v634_v34  ;;  %v643_v37 = vadd.f32 %v642_v36, %v640_v35 }
 0x145   :  { %644 = vadd.xlane.f32.xlu1 %v643_v37 }
 0x1b0   :  { %v318_v38 = vpop.xlane.xlu0 %317 }
 0x1b1   :  { %v328_v39 = vmul.f32 0.001953125, %v318_v38 }
 0x1b2   :  { %v327_v40 = vpop.xlane.xlu1 %326 }
 0x1b3   :  { %v330_v41 = vmul.f32 %v328_v39, %v328_v39  ;;  %v329_v42 = vmul.f32 0.001953125, %v327_v40  ;;  %v335_v46 = vsub.f32 0.0, %v328_v39 }
 0x1b5   :  { %v331_v43 = vsub.f32 %v329_v42, %v330_v41 }
 0x1b7   :  { %v332_v44 = vmax.f32 %v331_v43, 0.0 }
 0x1b9   :  { %v333_v45 = vadd.f32 1e-05, %v332_v44 }
 0x1bb   :  { %862 = vrsqrt.f32 %v333_v45 }
 0x1c5   :  { %v863_v47 = vpop.eup %862 }
 0x1c6   :  { %v336_v48 = vmul.f32 %v863_v47, %v335_v46  ;;  %v337_v49 = vmul.f32 %v863_v47, %v266_v2  ;;  %v338_v50 = vmul.f32 %v863_v47, %v268_v5  ;;  %v339_v51 = vmul.f32 %v863_v47, %v307_v3 }
 0x1c7   :  { %v340_v52 = vmul.f32 %v863_v47, %v309_v6 }
 0x1c8   :  { %v341_v53 = vadd.f32 %v337_v49, %v336_v48  ;;  %v342_v54 = vadd.f32 %v338_v50, %v336_v48  ;;  %v343_v55 = vadd.f32 %v339_v51, %v336_v48 }
 0x1c9   :  { %v344_v56 = vadd.f32 %v340_v52, %v336_v48 }
 0x1ca   :  { %v345_v57 = vmul.f32 0.2, %v341_v53  ;;  %v346_v58 = vmul.f32 0.2, %v342_v54  ;;  %v347_v59 = vmul.f32 0.2, %v343_v55 }
 0x1cb   :  { %v348_v60 = vmul.f32 0.2, %v344_v56 }
 0x1cc   :  { %v349_v61 = vmax.f32 %v341_v53, %v345_v57  ;;  %v350_v62 = vmax.f32 %v342_v54, %v346_v58  ;;  %v351_v63 = vmax.f32 %v343_v55, %v347_v59 }
 0x1cd   :  { %v352_v0 = vmax.f32 %v344_v56, %v348_v60 }
 0x1ce   :  { %353 = vst [vmem:[#allocation7] sm:$0xff] %v349_v61  ;;  %354 = vst [vmem:[#allocation7 + $0x8] sm:$0xff] %v350_v62 }
 0x1cf   :  { %355 = vst [vmem:[#allocation7 + $0x10] sm:$0xff] %v351_v63  ;;  %356 = vst [vmem:[#allocation7 + $0x18] sm:$0xff] %v352_v0 }
 0x1d0   :  { %v636_v1 = vpop.xlane.xlu0 %635 }
 0x1d1   :  { %v646_v2 = vmul.f32 0.001953125, %v636_v1 }
 0x1d2   :  { %v645_v3 = vpop.xlane.xlu1 %644 }
 0x1d3   :  { %v648_v4 = vmul.f32 %v646_v2, %v646_v2  ;;  %v647_v5 = vmul.f32 0.001953125, %v645_v3  ;;  %v653_v9 = vsub.f32 0.0, %v646_v2 }
 0x1d5   :  { %v649_v6 = vsub.f32 %v647_v5, %v648_v4 }
 0x1d7   :  { %v650_v7 = vmax.f32 %v649_v6, 0.0 }
 0x1d9   :  { %v651_v8 = vadd.f32 1e-05, %v650_v7 }
 0x1db   :  { %864 = vrsqrt.f32 %v651_v8 }
 0x1e5   :  { %v865_v10 = vpop.eup %864 }
 0x1e6   :  { %v654_v11 = vmul.f32 %v865_v10, %v653_v9  ;;  %v655_v12 = vmul.f32 %v865_v10, %v1002_v20  ;;  %v656_v13 = vmul.f32 %v865_v10, %v586_v23  ;;  %v657_v14 = vmul.f32 %v865_v10, %v1004_v21 }
 0x1e7   :  { %v658_v15 = vmul.f32 %v865_v10, %v1008_v24 }
 0x1e8   :  { %v659_v16 = vadd.f32 %v655_v12, %v654_v11  ;;  %v660_v17 = vadd.f32 %v656_v13, %v654_v11  ;;  %v661_v18 = vadd.f32 %v657_v14, %v654_v11 }
 0x1e9   :  { %v662_v19 = vadd.f32 %v658_v15, %v654_v11 }
 0x1ea   :  { %v663_v22 = vmul.f32 0.2, %v659_v16  ;;  %v664_v25 = vmul.f32 0.2, %v660_v17  ;;  %v665_v26 = vmul.f32 0.2, %v661_v18 }
 0x1eb   :  { %v666_v27 = vmul.f32 0.2, %v662_v19 }
 0x1ec   :  { %v667_v28 = vmax.f32 %v659_v16, %v663_v22  ;;  %v668_v29 = vmax.f32 %v660_v17, %v664_v25  ;;  %v669_v30 = vmax.f32 %v661_v18, %v665_v26 }
 0x1ed   :  { %v670_v20 = vmax.f32 %v662_v19, %v666_v27 }
 0x1ee   :  { %672 = vst [vmem:[#allocation7 + $0x20] sm:$0xff] %v667_v28  ;;  %673 = vst [vmem:[#allocation7 + $0x28] sm:$0xff] %v668_v29 }
 0x1ef   :  { %674 = vst [vmem:[#allocation7 + $0x30] sm:$0xff] %v669_v30  ;;  %675 = vst [vmem:[#allocation7 + $0x38] sm:$0xff] %v670_v20 }
 0x1f0   :  { %921 = shalt.err (!%p918_p6)
}
 0x1f1   :  { %s922_s10 = scalar_lea.hbm %s1034_s2, 1024 }
 0x1f2   :  { %p923_p7 = scmp.ne.s32.totalorder %s1034_s2, %s922_s10  ;;  %p926_p8 = scmp.lt.u32.totalorder %s922_s10, %s1034_s2 }
 0x1f4   :  { %p928_p9 = pnand %p926_p8, %p923_p7 }
 0x1f6   :  { %931 = shalt.err (!%p928_p9)
}
 0x1f7   :  { %s944_s15 = smov 512   ;;  %s945_s16 = smov 32  }
 0x1f8   :  { %687 = dma.vmem_to_hbm [thread:$0]  %s682_s6, 1024, %s1034_s2, [#allocation4], %s944_s15, %s944_s15, %s945_s16  }
 0x1f9   :  { %936 = dma.done.wait [#allocation4], 1024  }
 0x1fa   :  { %937 = vsyncadd [#allocation4], 4294966272 }
 0x1fb   :  { %691 = vsyncpa [#allocation3], 1 }
 0x1fc   :  { %692 = vsyncpa [#allocation6], 1 }
 0x1fd   :  { %693 = vsyncpa [#allocation4], 1 }

</bundles_post_ra>
